<compile_context>
chip_gen: v5e
topology: v5e:2x2
jax: 0.10.0
libtpu: 0.0.40
codegen_flags: <defaults>
</compile_context>

<pallas_src>
import functools
import math

import jax
import jax.numpy as jnp
from jax.experimental import pallas as pl
from jax.experimental.pallas import tpu as pltpu

NUM_MUS = 5
ACTION_DIM = NUM_MUS
STATE_DIM = 2 * NUM_MUS
IN_DIM = STATE_DIM + ACTION_DIM  # 15
HIDDEN = 64


def _disc_kernel(x_ref, w1t_ref, b1_ref, w2t_ref, b2_ref, w3t_ref, b3_ref,
                 o_ref):
    """Feature-major 3-layer MLP on one batch tile.

    The batch stays on the lane (last) axis everywhere, so every matmul output
    is lane-dense along the batch and no activation transpose is needed:
        h1^T = relu(w1^T @ x^T + b1)   : (64, TB)
        h2^T = relu(w2^T @ h1^T + b2)  : (64, TB)
        o    = w3^T @ h2^T + b3        : (1,  TB)   lane-dense output row
    """
    x = x_ref[...]                                                   # (15, TB)
    h1 = jnp.dot(w1t_ref[...], x, preferred_element_type=jnp.float32)
    h1 = jnp.maximum(h1 + b1_ref[...], 0.0)                          # (64, TB)
    h2 = jnp.dot(w2t_ref[...], h1, preferred_element_type=jnp.float32)
    h2 = jnp.maximum(h2 + b2_ref[...], 0.0)                          # (64, TB)
    o = jnp.dot(w3t_ref[...], h2, preferred_element_type=jnp.float32)  # (1,TB)
    o_ref[...] = (o + b3_ref[0]).astype(o_ref.dtype)


def _pick_batch_tile(batch, block_b):
    """Lane-dense batch tile (multiple of 128).

    * Capped at 8192 so double-buffered input blocks plus the (64, TB) f32
      intermediates stay comfortably inside v7x's smaller 64 MiB VMEM.
    * When the batch spans >= 2 lane blocks, guarantees >= 2 grid steps so
      dimension_semantics=("parallel",) can shard the grid across the two v7x
      TensorCores (no effect on the single-TC v5e/v6e).
    """
    lane_blocks = -(-batch // 128)                      # ceil(batch / 128)
    max_blocks = max(1, min(int(block_b), 8192) // 128)
    if lane_blocks >= 2:
        tile_blocks = max(1, min(max_blocks, (lane_blocks + 1) // 2))
    else:
        tile_blocks = 1
    return 128 * tile_blocks


@functools.partial(jax.jit, static_argnames=("block_b",))
def discriminator_forward_packed(x_t, params, block_b=2048):
    """x_t: feature-major packed input (IN_DIM, B) = concat([state, action]).T.

    Returns (B, 1) float32.  This is the zero-copy entry point for callers
    that already hold feature-major data.
    """
    w1, b1, w2, b2, w3, b3 = params
    x_t = x_t.astype(jnp.float32)
    in_dim, b = x_t.shape
    assert in_dim == IN_DIM, in_dim

    tb = _pick_batch_tile(b, block_b)
    n_tiles = -(-b // tb)                    # ceil(b / tb); ragged edge clipped
    b_pad = n_tiles * tb                     # padding only on the output slab

    # Pre-transposed weights / column biases (tiny; in production store them
    # in this layout so no per-call transpose is traced at all).
    w1t = w1.T.astype(jnp.float32)                    # (64, 15)
    w2t = w2.T.astype(jnp.float32)                    # (64, 64)
    w3t = w3.reshape(1, HIDDEN).astype(jnp.float32)   # (1, 64)  (w3 is (64,1))
    b1c = b1.reshape(HIDDEN, 1).astype(jnp.float32)   # (64, 1)  lane-broadcast
    b2c = b2.reshape(HIDDEN, 1).astype(jnp.float32)   # (64, 1)
    b3s = b3.reshape(1).astype(jnp.float32)           # SMEM scalar

    out_row = pl.pallas_call(
        _disc_kernel,
        out_shape=jax.ShapeDtypeStruct((1, b_pad), jnp.float32),
        grid_spec=pltpu.PrefetchScalarGridSpec(
            num_scalar_prefetch=0,
            grid=(n_tiles,),
            in_specs=[
                pl.BlockSpec((IN_DIM, tb), lambda i: (0, i)),       # x^T tile
                pl.BlockSpec((HIDDEN, IN_DIM), lambda i: (0, 0)),   # w1^T
                pl.BlockSpec((HIDDEN, 1), lambda i: (0, 0)),        # b1 column
                pl.BlockSpec((HIDDEN, HIDDEN), lambda i: (0, 0)),   # w2^T
                pl.BlockSpec((HIDDEN, 1), lambda i: (0, 0)),        # b2 column
                pl.BlockSpec((1, HIDDEN), lambda i: (0, 0)),        # w3^T row
                pl.BlockSpec(memory_space=pltpu.MemorySpace.SMEM),  # b3 scalar
            ],
            out_specs=pl.BlockSpec((1, tb), lambda i: (0, i)),      # lane-dense
        ),
        compiler_params=pltpu.CompilerParams(
            dimension_semantics=("parallel",)),
    )(x_t, w1t, b1c, w2t, b2c, w3t, b3s)

    # (1, b_pad) lane-dense row -> (B, 1) column, dropping the ragged tail.
    return out_row[0, :b].reshape(b, 1)


@functools.partial(jax.jit, static_argnames=("block_b",))
def discriminator_forward(state, action, params, block_b=2048):
    """state: (B, STATE_DIM), action: (B, ACTION_DIM) -> (B, 1) float32.

    Matches the PyTorch module's forward().  Batch-major inputs are packed
    into one feature-major (15, B) slab; if the caller can supply that layout
    directly, use `discriminator_forward_packed` and skip this pack pass.
    """
    x_t = jnp.concatenate(
        [state.astype(jnp.float32), action.astype(jnp.float32)], axis=1).T
    return discriminator_forward_packed(x_t, params, block_b=block_b)


def init_params(key):
    """Deterministic init matching nn.Linear default U(-1/sqrt(fan_in), +)."""
    dims = [(IN_DIM, HIDDEN), (HIDDEN, HIDDEN), (HIDDEN, 1)]
    params = []
    keys = jax.random.split(key, 2 * len(dims))
    for li, (fan_in, fan_out) in enumerate(dims):
        bound = 1.0 / math.sqrt(fan_in)
        w = jax.random.uniform(keys[2 * li], (fan_in, fan_out),
                               minval=-bound, maxval=bound, dtype=jnp.float32)
        bvec = jax.random.uniform(keys[2 * li + 1], (1, fan_out),
                                  minval=-bound, maxval=bound,
                                  dtype=jnp.float32)
        params.extend([w, bvec])
    return tuple(params)


def _reference(state, action, params):
    w1, b1, w2, b2, w3, b3 = params
    x = jnp.concatenate([state, action], axis=1)
    x = jnp.maximum(x @ w1 + b1, 0.0)
    x = jnp.maximum(x @ w2 + b2, 0.0)
    return x @ w3 + b3


if __name__ == "__main__":
    key = jax.random.PRNGKey(0)
    kp, ks, ka = jax.random.split(key, 3)

    # Small demo: batch=200 is not a multiple of 128, so it exercises the
    # clipped ragged-edge block AND a 2-step grid (128-lane tiles).
    batch = 200
    state = jax.random.normal(ks, (batch, STATE_DIM), dtype=jnp.float32)
    action = jax.random.normal(ka, (batch, ACTION_DIM), dtype=jnp.float32)
    params = init_params(kp)

    out = discriminator_forward(state, action, params)
    out = jax.block_until_ready(out)

    ref = _reference(state, action, params)
    assert out.shape == (batch, 1), out.shape
    # Tolerance covers possible MXU default-precision (bf16-pass) differences
    # between the Pallas matmul and the XLA reference; with matched precisions
    # the observed difference is <1e-5.
    err = float(jnp.max(jnp.abs(out - ref)))
    assert err < 1e-2, f"max abs err {err}"

    print("KERNEL_OK")
</pallas_src>

<mosaic_0001>
module attributes {stable_mosaic.version = 11 : i64} {
  func.func @_disc_kernel(%arg0: i32, %arg1: memref<15x128xf32, #tpu.memory_space<vmem>>, %arg2: memref<64x15xf32, #tpu.memory_space<vmem>>, %arg3: memref<64x1xf32, #tpu.memory_space<vmem>>, %arg4: memref<64x64xf32, #tpu.memory_space<vmem>>, %arg5: memref<64x1xf32, #tpu.memory_space<vmem>>, %arg6: memref<1x64xf32, #tpu.memory_space<vmem>>, %arg7: memref<1xf32, #tpu.memory_space<smem>>, %arg8: memref<1x128xf32, #tpu.memory_space<vmem>>) attributes {dimension_semantics = [#tpu.dimension_semantics<parallel>], iteration_bounds = array<i64: 2>, scalar_prefetch = 0 : i64, scratch_operands = 0 : i64, tpu.core_type = #tpu.core_type<tc>, window_params = [{transform_indices = @transform_0, window_bounds = array<i64: 15, 128>}, {pipeline_mode = #tpu.pipeline_mode<synchronous>, transform_indices = @transform_1, window_bounds = array<i64: 64, 15>}, {pipeline_mode = #tpu.pipeline_mode<synchronous>, transform_indices = @transform_2, window_bounds = array<i64: 64, 1>}, {pipeline_mode = #tpu.pipeline_mode<synchronous>, transform_indices = @transform_3, window_bounds = array<i64: 64, 64>}, {pipeline_mode = #tpu.pipeline_mode<synchronous>, transform_indices = @transform_4, window_bounds = array<i64: 64, 1>}, {pipeline_mode = #tpu.pipeline_mode<synchronous>, transform_indices = @transform_5, window_bounds = array<i64: 1, 64>}, {transform_indices = @transform_6, window_bounds = array<i64: 1>}, {transform_indices = @transform_7, window_bounds = array<i64: 1, 128>}]} {
    %c0 = arith.constant 0 : index
    %c0_0 = arith.constant 0 : index
    %0 = vector.load %arg1[%c0, %c0_0] : memref<15x128xf32, #tpu.memory_space<vmem>>, vector<15x128xf32>
    %c0_1 = arith.constant 0 : index
    %c0_2 = arith.constant 0 : index
    %1 = vector.load %arg2[%c0_1, %c0_2] : memref<64x15xf32, #tpu.memory_space<vmem>>, vector<64x15xf32>
    %cst = arith.constant dense<0.000000e+00> : vector<64x128xf32>
    %2 = tpu.matmul %1, %0, %cst {dimension_numbers = #tpu.dot_dimension_numbers<[1], [0], [0], [1], [0, 0, 1, 1], [], []>} : vector<64x15xf32>, vector<15x128xf32>, vector<64x128xf32> -> vector<64x128xf32>
    %c0_3 = arith.constant 0 : index
    %c0_4 = arith.constant 0 : index
    %3 = vector.load %arg3[%c0_3, %c0_4] : memref<64x1xf32, #tpu.memory_space<vmem>>, vector<64x1xf32>
    %4 = vector.broadcast %3 : vector<64x1xf32> to vector<64x128xf32>
    %5 = arith.addf %2, %4 : vector<64x128xf32>
    %cst_5 = arith.constant 0.000000e+00 : f32
    %6 = vector.broadcast %cst_5 : f32 to vector<64x128xf32>
    %7 = arith.maximumf %5, %6 : vector<64x128xf32>
    %c0_6 = arith.constant 0 : index
    %c0_7 = arith.constant 0 : index
    %8 = vector.load %arg4[%c0_6, %c0_7] : memref<64x64xf32, #tpu.memory_space<vmem>>, vector<64x64xf32>
    %cst_8 = arith.constant dense<0.000000e+00> : vector<64x128xf32>
    %9 = tpu.matmul %8, %7, %cst_8 {dimension_numbers = #tpu.dot_dimension_numbers<[1], [0], [0], [1], [0, 0, 1, 1], [], []>} : vector<64x64xf32>, vector<64x128xf32>, vector<64x128xf32> -> vector<64x128xf32>
    %c0_9 = arith.constant 0 : index
    %c0_10 = arith.constant 0 : index
    %10 = vector.load %arg5[%c0_9, %c0_10] : memref<64x1xf32, #tpu.memory_space<vmem>>, vector<64x1xf32>
    %11 = vector.broadcast %10 : vector<64x1xf32> to vector<64x128xf32>
    %12 = arith.addf %9, %11 : vector<64x128xf32>
    %cst_11 = arith.constant 0.000000e+00 : f32
    %13 = vector.broadcast %cst_11 : f32 to vector<64x128xf32>
    %14 = arith.maximumf %12, %13 : vector<64x128xf32>
    %c0_12 = arith.constant 0 : index
    %c0_13 = arith.constant 0 : index
    %15 = vector.load %arg6[%c0_12, %c0_13] : memref<1x64xf32, #tpu.memory_space<vmem>>, vector<1x64xf32>
    %cst_14 = arith.constant dense<0.000000e+00> : vector<1x128xf32>
    %16 = tpu.matmul %15, %14, %cst_14 {dimension_numbers = #tpu.dot_dimension_numbers<[1], [0], [0], [1], [0, 0, 1, 1], [], []>} : vector<1x64xf32>, vector<64x128xf32>, vector<1x128xf32> -> vector<1x128xf32>
    %c0_15 = arith.constant 0 : index
    %17 = memref.load %arg7[%c0_15] : memref<1xf32, #tpu.memory_space<smem>>
    %18 = vector.broadcast %17 : f32 to vector<1x128xf32>
    %19 = arith.addf %16, %18 : vector<1x128xf32>
    %c0_16 = arith.constant 0 : index
    %c0_17 = arith.constant 0 : index
    %20 = vector.load %arg8[%c0_16, %c0_17] : memref<1x128xf32, #tpu.memory_space<vmem>>, vector<1x128xf32>
    tpu.vector_store %arg8[%c0_16, %c0_17], %19 {strides = array<i32>} : memref<1x128xf32, #tpu.memory_space<vmem>>, vector<1x128xf32>,
    return
  }
  func.func @transform_0(%arg0: i32) -> (i32, i32) {
    %c0_i32 = arith.constant 0 : i32
    %c0_i32_0 = arith.constant 0 : i32
    return %c0_i32, %arg0 : i32, i32
  }
  func.func @transform_1(%arg0: i32) -> (i32, i32) {
    %c0_i32 = arith.constant 0 : i32
    %c0_i32_0 = arith.constant 0 : i32
    %c0_i32_1 = arith.constant 0 : i32
    return %c0_i32, %c0_i32_0 : i32, i32
  }
  func.func @transform_2(%arg0: i32) -> (i32, i32) {
    %c0_i32 = arith.constant 0 : i32
    %c0_i32_0 = arith.constant 0 : i32
    %c0_i32_1 = arith.constant 0 : i32
    return %c0_i32, %c0_i32_0 : i32, i32
  }
  func.func @transform_3(%arg0: i32) -> (i32, i32) {
    %c0_i32 = arith.constant 0 : i32
    %c0_i32_0 = arith.constant 0 : i32
    %c0_i32_1 = arith.constant 0 : i32
    return %c0_i32, %c0_i32_0 : i32, i32
  }
  func.func @transform_4(%arg0: i32) -> (i32, i32) {
    %c0_i32 = arith.constant 0 : i32
    %c0_i32_0 = arith.constant 0 : i32
    %c0_i32_1 = arith.constant 0 : i32
    return %c0_i32, %c0_i32_0 : i32, i32
  }
  func.func @transform_5(%arg0: i32) -> (i32, i32) {
    %c0_i32 = arith.constant 0 : i32
    %c0_i32_0 = arith.constant 0 : i32
    %c0_i32_1 = arith.constant 0 : i32
    return %c0_i32, %c0_i32_0 : i32, i32
  }
  func.func @transform_6(%arg0: i32) -> i32 {
    %c0_i32 = arith.constant 0 : i32
    %c0_i32_0 = arith.constant 0 : i32
    return %c0_i32 : i32
  }
  func.func @transform_7(%arg0: i32) -> (i32, i32) {
    %c0_i32 = arith.constant 0 : i32
    %c0_i32_0 = arith.constant 0 : i32
    return %c0_i32, %arg0 : i32, i32
  }
}

</mosaic_0001>

<bundles_post_ra>
// kernel: discriminator_forward_packed.1
= control target key start
LH: loop header
LB: loop body
LE: loop exit
PB: predicated region body
PF: predicated region fallthrough
CT: control target
= control target key end

     0   :  { %s965_s0 = inlined_call_operand.vmem [shape: f32[15,200], index: 0, kind: input, shape index: {}]   ;;  %s966_s1 = inlined_call_operand.vmem [shape: f32[64,15], index: 1, kind: input, shape index: {}]   ;;  %s967_s2 = inlined_call_operand.vmem [shape: f32[64,1], index: 2, kind: input, shape index: {}]   ;;  %s968_s3 = inlined_call_operand.vmem [shape: f32[64,64], index: 3, kind: input, shape index: {}]   ;;  %s969_s4 = inlined_call_operand.vmem [shape: f32[64,1], index: 4, kind: input, shape index: {}]   ;;  %s970_s5 = inlined_call_operand.vmem [shape: f32[1,64], index: 5, kind: input, shape index: {}]   ;;  %s971_s6 = inlined_call_operand.<no memory space> [shape: f32[1], index: 6, kind: input, shape index: {}]   ;;  %s972_s7 = inlined_call_operand.vmem [shape: f32[1,256], index: 7, kind: output, shape index: {}]  }
   0x1   :  { %12 = sst [smem:[#allocation2]] %s971_s6 }
   0x2   :  { %s795_s26 = smov 0   ;;  %s797_s27 = smov 0  }
   0x3   :  { %s799_s28 = smov 0  }
   0x4 LB: > { %s661_s6 = sadd.s32 4294967295, %s749_s28   ;;  %s812_s29 = sadd.s32 1, %s749_s28   ;;  %s749_s28 = sphi %s799_s28, %s975_s28   ;;  %s745_s27 = sphi %s797_s27, %s974_s27   ;;  %s741_s26 = sphi %s795_s26, %s973_s26  }
   0x5   : > { %s22_s30 = ssub.s32 %s749_s28, %s812_s29  ;;  %s25_s8 = sadd.s32 1, %s745_s27 }
   0x6   : > { %p23_p0 = scmp.eq.s32.totalorder %s22_s30, 0  ;;  %p32_p1 = scmp.ne.s32.totalorder %s745_s27, %s741_s26 }
   0x7   : > { %p33_p2 = scmp.eq.s32.totalorder %s749_s28, 0  ;;  %p664_p4 = scmp.ge.s32.totalorder %s749_s28, 2 }
   0x8   : > { %s821_s9 = scalar_select %p23_p0, %s745_s27, %s25_s8  }
   0x9   : > { %p34_p3 = por %p33_p2, %p32_p1  ;;  %228 = sbr.rel (%p664_p4) target bundleno = 20 (0x14), region = 40 }
   0xe   : > { %231 = sbr.rel (!%p34_p3) target bundleno = 20 (0x14), region = 44  ;;  %s233_s10 = sand.u32 (%p34_p3), 1, %s745_s27  }
   0xf   : > { %s666_s11 = sshll.u32 (%p34_p3), %s749_s28, 3  ;;  %s665_s12 = sshll.u32 (%p34_p3), %s233_s10, 4 }
  0x10   : > { %s237_s15 = scalar_lea.vmem (%p34_p3), %s965_s0, %s666_s11  ;;  %s235_s16 = scalar_lea.vmem (%p34_p3), [#allocation3], %s665_s12 }
  0x11   : > { %v268_v0 = vld [vmem:[%s237_s15] sm:$0xff] (%p34_p3)  ;;  %v270_v1 = vld [vmem:[%s237_s15 + $0x10] sm:$0xff] (%p34_p3) }
  0x12   : > { %269 = vst [vmem:[%s235_s16] sm:$0xff] (%p34_p3), %v268_v0 }
  0x13   : > { %271 = vst [vmem:[%s235_s16 + $0x8] sm:$0xff] %v270_v1 }
  0x14 PF: > { %p667_p5 = scmp.ge.s32.totalorder %s749_s28, 1  ;;  %p276_p6 = scmp.lt.s32.totalorder %s749_s28, 3 }
  0x16   : > { %p277_p7 = pnand %p667_p5, %p276_p6 }
  0x17   : > { %s283_s21 = sand.u32 (!%p277_p7), 1, %s741_s26   ;;  %s582_s10 = sld [smem:[#allocation2]] (!%p277_p7) }
  0x18   : > { %280 = sbr.rel (%p277_p7) target bundleno = 516 (0x204), region = 82  ;;  %s668_s22 = sshll.u32 (!%p277_p7), %s283_s21, 4 }
  0x19   : > { %s285_s23 = scalar_lea.vmem (!%p277_p7), [#allocation3], %s668_s22  ;;  %p312_p8 = scmp.lt.s32.totalorder (!%p277_p7), %s661_s6, 1 }
  0x1d   : > { %v332_v2 = vld [vmem:[%s967_s2 + $0x38] sm:$0xff]  ;;  %v330_v3 = vld [vmem:[%s967_s2 + $0x28] sm:$0xff]  ;;  %v751_v4 = vmov 0   ;;  %vm398_vm0 = vcmask 1046528   ;;  %v315_v6 = vld [vmem:[%s285_s23] sm:$0xff]  ;;  %vm373_vm1 = vcmask 121856  }
  0x1e   : > { %725 = vset.pattern.permute.xlu1 %v751_v4  ;;  %724 = vset.pattern.permute.xlu0 %v751_v4  ;;  %v316_v5 = vld [vmem:[%s285_s23 + $0x8] sm:$0x7f]  ;;  %v317_v7 = vld [vmem:[%s966_s1] sm:$0xff]  ;;  %v331_v10 = vld [vmem:[%s967_s2 + $0x30] sm:$0xff]  ;;  %vm507_vm2 = vcmask 523264   ;;  %s977_s6 = smov (!%p312_p8, %s661_s6), 1 }
  0x1f   : > { %370 = vperm.xlu0 %724, %v332_v2   ;;  %360 = vperm.xlu1 %725, %v330_v3   ;;  %v322_v8 = vld [vmem:[%s966_s1 + $0x28] sm:$0xff]  ;;  %v328_v9 = vld [vmem:[%s967_s2 + $0x18] sm:$0xff]  ;;  %v329_v11 = vld [vmem:[%s967_s2 + $0x20] sm:$0xff]  ;;  %s314_s13 = scalar_lea.vmem %s972_s7, %s977_s6 }
  0x20   : > { %726 = vset.pattern.permute.xlu2 %v751_v4  ;;  %669 = vmatpush.msk.msra.mxu0 %vm398_vm0, %v316_v5  ;;  %v318_v12 = vld [vmem:[%s966_s1 + $0x8] sm:$0xff]  ;;  %v323_v13 = vld [vmem:[%s966_s1 + $0x30] sm:$0xff]  ;;  %v325_v16 = vld [vmem:[%s967_s2] sm:$0xff] }
  0x21   : > { %689 = vmatpush.msk.msra.mxu2 %vm398_vm0, %v316_v5  ;;  %350 = vperm.xlu2 %726, %v328_v9   ;;  %v327_v14 = vld [vmem:[%s967_s2 + $0x10] sm:$0xff]  ;;  %v326_v15 = vld [vmem:[%s967_s2 + $0x8] sm:$0xff]  ;;  %v324_v18 = vld [vmem:[%s966_s1 + $0x38] sm:$0xff] }
  0x22   : > { %417 = vmatpush.msra.mxu0 %v315_v6  ;;  %v319_v17 = vld [vmem:[%s966_s1 + $0x10] sm:$0xff]  ;;  %v466_v19 = vld [vmem:[%s969_s4 + $0x38] sm:$0xff]  ;;  %v464_v21 = vld [vmem:[%s969_s4 + $0x28] sm:$0xff] }
  0x23   : > { %690 = vmatpush.msra.mxu2 %v315_v6  ;;  %670 = vmatmul.msk.f32.vlgmr.msra.gmra.mxu0 %vm373_vm1, %v317_v7  ;;  %v465_v20 = vld [vmem:[%s969_s4 + $0x30] sm:$0xff]  ;;  %v320_v22 = vld [vmem:[%s966_s1 + $0x18] sm:$0xff]  ;;  %v463_v23 = vld [vmem:[%s969_s4 + $0x20] sm:$0xff] }
  0x24   : > { %675 = vmatmul.msk.f32.vlgmr.msra.gmra.mxu2 %vm373_vm1, %v322_v8  ;;  %v462_v24 = vld [vmem:[%s969_s4 + $0x18] sm:$0xff]  ;;  %v461_v25 = vld [vmem:[%s969_s4 + $0x10] sm:$0xff]  ;;  %v321_v26 = vld [vmem:[%s966_s1 + $0x20] sm:$0xff] }
  0x25   : > { %v460_v27 = vld [vmem:[%s969_s4 + $0x8] sm:$0xff]  ;;  %v459_v28 = vld [vmem:[%s969_s4] sm:$0xff]  ;;  %v453_v1 = vld [vmem:[%s968_s3 + $0x10] sm:$0xff] }
  0x26   : > { %v451_v61 = vld [vmem:[%s968_s3] sm:$0xff]  ;;  %v452_v63 = vld [vmem:[%s968_s3 + $0x8] sm:$0xff]  ;;  %v457_v2 = vld [vmem:[%s968_s3 + $0x30] sm:$0xff] }
  0x27   : > { %365 = vperm.xlu0 %724, %v331_v10   ;;  %355 = vperm.xlu1 %725, %v329_v11   ;;  %v455_v62 = vld [vmem:[%s968_s3 + $0x20] sm:$0xff]  ;;  %v456_v0 = vld [vmem:[%s968_s3 + $0x28] sm:$0xff]  ;;  %v454_v3 = vld [vmem:[%s968_s3 + $0x18] sm:$0xff] }
  0x28   : > { %v458_v4 = vld [vmem:[%s968_s3 + $0x38] sm:$0xff] }
  0x29   : > { %345 = vperm.xlu2 %726, %v327_v14  }
  0x2b   : > { %671 = vmatmul.msk.f32.gmra.mxu0 %vm373_vm1, %v318_v12 }
  0x2c   : > { %676 = vmatmul.msk.f32.gmra.mxu2 %vm373_vm1, %v323_v13 }
  0x2f   : > { %340 = vperm.xlu0 %724, %v326_v15   ;;  %335 = vperm.xlu1 %725, %v325_v16  }
  0x31   : > { %504 = vperm.xlu2 %726, %v466_v19  }
  0x33   : > { %672 = vmatmul.msk.f32.gmra.mxu0 %vm373_vm1, %v319_v17 }
  0x34   : > { %677 = vmatmul.msk.f32.gmra.mxu2 %vm373_vm1, %v324_v18 }
  0x37   : > { %499 = vperm.xlu0 %724, %v465_v20   ;;  %494 = vperm.xlu1 %725, %v464_v21  }
  0x39   : > { %489 = vperm.xlu2 %726, %v463_v23  }
  0x3b   : > { %673 = vmatmul.msk.f32.gmra.mxu0 %vm373_vm1, %v320_v22 }
  0x3f   : > { %484 = vperm.xlu0 %724, %v462_v24   ;;  %479 = vperm.xlu1 %725, %v461_v25  }
  0x41   : > { %474 = vperm.xlu2 %726, %v460_v27  }
  0x43   : > { %674 = vmatmul.msk.f32.gmra.mxu0 %vm373_vm1, %v321_v26 }
  0x47   : > { %469 = vperm.xlu0 %724, %v459_v28  }
  0x7b   : > { %v351_v40 = vpop.permute.xlu2 %350 }
  0x83   : > { %v346_v50 = vpop.permute.xlu2 %345 }
  0x8b   : > { %v505_v9 = vpop.permute.xlu2 %504 }
  0x91   : > { %v371_v32 = vpop.permute.xlu0 %370  ;;  %v361_v34 = vpop.permute.xlu1 %360 }
  0x93   : > { %v490_v14 = vpop.permute.xlu2 %489 }
  0x99   : > { %v366_v36 = vpop.permute.xlu0 %365  ;;  %v356_v44 = vpop.permute.xlu1 %355 }
  0xa0   : > { %v419_v29 = vpop.f32.mrf.mxu0 }
  0xa1   : > { %v341_v53 = vpop.permute.xlu0 %340  ;;  %v336_v54 = vpop.permute.xlu1 %335 }
  0xa2   : > { %v420_v57 = vadd.f32 %v419_v29, %v336_v54  ;;  %v475_v29 = vpop.permute.xlu2 %474 }
  0xa4   : > { %v443_v60 = vmax.f32 %v420_v57, 0.0 }
  0xa7   : > { %v434_v30 = vpop.f32.mrf.mxu2 }
  0xa8   : > { %v422_v31 = vpop.f32.mrf.mxu0  ;;  %v435_v41 = vadd.f32 %v434_v30, %v361_v34 }
  0xa9   : > { %v423_v55 = vadd.f32 %v422_v31, %v341_v53  ;;  %v500_v10 = vpop.permute.xlu0 %499  ;;  %v495_v13 = vpop.permute.xlu1 %494 }
  0xaa   : > { %v448_v46 = vmax.f32 %v435_v41, 0.0 }
  0xab   : > { %v444_v59 = vmax.f32 %v423_v55, 0.0 }
  0xaf   : > { %v437_v33 = vpop.f32.mrf.mxu2 }
  0xb0   : > { %v425_v35 = vpop.f32.mrf.mxu0  ;;  %v438_v38 = vadd.f32 %v437_v33, %v366_v36 }
  0xb1   : > { %v426_v51 = vadd.f32 %v425_v35, %v346_v50  ;;  %v485_v18 = vpop.permute.xlu0 %484  ;;  %v480_v26 = vpop.permute.xlu1 %479 }
  0xb2   : > { %v449_v45 = vmax.f32 %v438_v38, 0.0  ;;  %v583_v38 = vstv %s582_s10 }
  0xb3   : > { %v445_v58 = vmax.f32 %v426_v51, 0.0 }
  0xb7   : > { %v440_v37 = vpop.f32.mrf.mxu2 }
  0xb8   : > { %v441_v39 = vadd.f32 %v440_v37, %v371_v32  ;;  %v428_v43 = vpop.f32.mrf.mxu0  ;;  %v581_v37 = vld [vmem:[%s970_s5] sm:$0x1] }
  0xb9   : > { %v429_v48 = vadd.f32 %v428_v43, %v351_v40  ;;  %v470_v32 = vpop.permute.xlu0 %469 }
  0xba   : > { %v450_v42 = vmax.f32 %v441_v39, 0.0 }
  0xbb   : > { %v446_v56 = vmax.f32 %v429_v48, 0.0 }
  0xbc   : > { %540 = vmatpush.msra.mxu1 %v450_v42  ;;  %691 = vmatpush.msra.mxu3 %v450_v42 }
  0xbe   : > { %541 = vmatpush.msra.mxu1 %v449_v45  ;;  %692 = vmatpush.msra.mxu3 %v449_v45 }
  0xc0   : > { %542 = vmatpush.msra.mxu1 %v448_v46  ;;  %693 = vmatpush.msra.mxu3 %v448_v46  ;;  %v431_v47 = vpop.f32.mrf.mxu0 }
  0xc1   : > { %v432_v49 = vadd.f32 %v431_v47, %v356_v44 }
  0xc3   : > { %v447_v52 = vmax.f32 %v432_v49, 0.0 }
  0xc5   : > { %543 = vmatpush.msra.mxu1 %v447_v52  ;;  %694 = vmatpush.msra.mxu3 %v447_v52 }
  0xc7   : > { %544 = vmatpush.msra.mxu1 %v446_v56  ;;  %695 = vmatpush.msra.mxu3 %v446_v56 }
  0xc9   : > { %545 = vmatpush.msra.mxu1 %v445_v58  ;;  %696 = vmatpush.msra.mxu3 %v445_v58 }
  0xcb   : > { %546 = vmatpush.msra.mxu1 %v444_v59  ;;  %697 = vmatpush.msra.mxu3 %v444_v59 }
  0xcd   : > { %547 = vmatpush.msra.mxu1 %v443_v60  ;;  %698 = vmatpush.msra.mxu3 %v443_v60 }
  0xce   : > { %678 = vmatmul.msk.f32.vlgmr.msra.gmra.mxu1 %vm507_vm2, %v451_v61  ;;  %682 = vmatmul.msk.f32.vlgmr.msra.gmra.mxu3 %vm507_vm2, %v455_v62 }
  0xd6   : > { %679 = vmatmul.msk.f32.gmra.mxu1 %vm507_vm2, %v452_v63  ;;  %683 = vmatmul.msk.f32.gmra.mxu3 %vm507_vm2, %v456_v0 }
  0xde   : > { %680 = vmatmul.msk.f32.gmra.mxu1 %vm507_vm2, %v453_v1  ;;  %684 = vmatmul.msk.f32.gmra.mxu3 %vm507_vm2, %v457_v2 }
  0xe6   : > { %681 = vmatmul.msk.f32.gmra.mxu1 %vm507_vm2, %v454_v3  ;;  %685 = vmatmul.msk.f32.gmra.mxu3 %vm507_vm2, %v458_v4 }
 0x14b   : > { %v549_v5 = vpop.f32.mrf.mxu1 }
 0x14c   : > { %v550_v33 = vadd.f32 %v549_v5, %v470_v32 }
 0x14e   : > { %v573_v36 = vmax.f32 %v550_v33, 0.0 }
 0x151   : > { %v561_v6 = vpop.f32.mrf.mxu3 }
 0x152   : > { %v562_v22 = vadd.f32 %v561_v6, %v490_v14 }
 0x153   : > { %v552_v7 = vpop.f32.mrf.mxu1 }
 0x154   : > { %v577_v27 = vmax.f32 %v562_v22, 0.0  ;;  %v553_v30 = vadd.f32 %v552_v7, %v475_v29 }
 0x156   : > { %v574_v35 = vmax.f32 %v553_v30, 0.0 }
 0x159   : > { %v564_v8 = vpop.f32.mrf.mxu3 }
 0x15a   : > { %v565_v19 = vadd.f32 %v564_v8, %v495_v13 }
 0x15b   : > { %v555_v12 = vpop.f32.mrf.mxu1 }
 0x15c   : > { %v578_v24 = vmax.f32 %v565_v19, 0.0  ;;  %v556_v28 = vadd.f32 %v555_v12, %v480_v26 }
 0x15e   : > { %v575_v34 = vmax.f32 %v556_v28, 0.0 }
 0x161   : > { %v567_v11 = vpop.f32.mrf.mxu3 }
 0x162   : > { %v568_v16 = vadd.f32 %v567_v11, %v500_v10 }
 0x163   : > { %v558_v21 = vpop.f32.mrf.mxu1 }
 0x164   : > { %v579_v23 = vmax.f32 %v568_v16, 0.0  ;;  %v559_v25 = vadd.f32 %v558_v21, %v485_v18 }
 0x166   : > { %v576_v31 = vmax.f32 %v559_v25, 0.0 }
 0x169   : > { %v570_v15 = vpop.f32.mrf.mxu3 }
 0x16a   : > { %v571_v17 = vadd.f32 %v570_v15, %v505_v9 }
 0x16c   : > { %v580_v20 = vmax.f32 %v571_v17, 0.0 }
 0x16e   : > { %595 = vmatpush.msrb.mxu2 %v580_v20 }
 0x170   : > { %596 = vmatpush.msrb.mxu2 %v579_v23 }
 0x172   : > { %597 = vmatpush.msrb.mxu2 %v578_v24 }
 0x174   : > { %598 = vmatpush.msrb.mxu2 %v577_v27 }
 0x176   : > { %599 = vmatpush.msrb.mxu2 %v576_v31 }
 0x178   : > { %600 = vmatpush.msrb.mxu2 %v575_v34 }
 0x17a   : > { %601 = vmatpush.msrb.mxu2 %v574_v35 }
 0x17c   : > { %602 = vmatpush.msrb.mxu2 %v573_v36 }
 0x17d   : > { %686 = vmatmul.msk.f32.vlgmr.msrb.gmra.mxu2 %vm507_vm2, %v581_v37 }
 0x200   : > { %v604_v39 = vpop.f32.mrf.mxu2 }
 0x201   : > { %v605_v40 = vadd.f32 %v604_v39, %v583_v38 }
 0x203   : > { %607 = vst [vmem:[%s314_s13] sm:$0x1] %v605_v40 }
 0x204 PF: > { %p15_p9 = scmp.ge.s32.totalorder %s812_s29, 4   ;;  %s973_s26 = smov %s745_s27 }
 0x205   : > { %s974_s27 = smov %s821_s9  ;;  %s975_s28 = smov %s812_s29 }
 0x206   :  { %17 = sbr.rel (!%p15_p9) target bundleno = 4 (0x4), region = 121 }

</bundles_post_ra>
